<compile_context>
chip_gen: v7x
topology: tpu7x:2x2x1
jax: 0.10.0
libtpu: 0.0.40
codegen_flags: <defaults>
</compile_context>

<pallas_src>
import jax
import jax.numpy as jnp
from jax.experimental import pallas as pl
from jax.experimental.pallas import tpu as pltpu


def _discriminator_kernel(x_ref, w1_ref, wh_ref, bh_ref, w5_ref, b5_ref, o_ref):
    # x arrives as f32; cast to bf16 on the VPU here instead of a separate
    # wrapper-side XLA pass over HBM.
    x = x_ref[...].astype(jnp.bfloat16)
    biases = bh_ref[...]                       # (4, H) f32, loaded once

    # Layer 1: (tile_b, n_z) @ (n_z, H) on the MXU, f32 accumulation.
    h = jnp.dot(x, w1_ref[...], preferred_element_type=jnp.float32)
    h = jnp.maximum(h + biases[0], 0.0)

    # Layers 2-4: stacked (3, H, H) bf16 weights, static slice per layer.
    for k in range(3):
        h = jnp.dot(h.astype(jnp.bfloat16), wh_ref[k],
                    preferred_element_type=jnp.float32)
        h = jnp.maximum(h + biases[k + 1], 0.0)

    # Layer 5 (out_features == 1), lane-dense: (1, H) @ (H, tile_b) -> (1, tile_b)
    # so the output is a dense row of lanes rather than a 1-lane column.
    logits = jnp.dot(w5_ref[...], h.T, preferred_element_type=jnp.float32)
    logits = logits + b5_ref[0]                # scalar bias from SMEM

    # Exact sigmoid: exp rides the EUP slot; the divide is cheap and exact.
    o_ref[0] = (1.0 / (1.0 + jnp.exp(-logits))).astype(o_ref.dtype)


def discriminator_forward(x, params, *, tile_b=1024):
    """x: (B, n_z) float32. params: w1..w5 stored (in, out), b1..b5 stored (1, out)."""
    B, n_z = x.shape
    H = params["w1"].shape[1]

    # Small / inference-sized batches: size the single tile to the batch
    # (rounded up to 16 rows for bf16 sublane packing) instead of padding to a
    # full large tile.
    if B <= tile_b:
        tile_b = max(16, ((B + 15) // 16) * 16)

    num_tiles = pl.cdiv(B, tile_b)
    b_pad = num_tiles * tile_b
    if b_pad != B:                 # only pad when B is not already a tile multiple
        x = jnp.pad(x, ((0, b_pad - B), (0, 0)))
    x = x.astype(jnp.float32)      # bf16 cast happens inside the kernel

    # MXU operands in bf16; biases and the final VPU/small-matmul layer stay f32.
    w1 = params["w1"].astype(jnp.bfloat16)                                   # (n_z, H)
    wh = jnp.stack([params["w2"], params["w3"], params["w4"]]
                   ).astype(jnp.bfloat16)                                    # (3, H, H)
    bh = jnp.concatenate([params[f"b{i}"] for i in range(1, 5)],
                         axis=0).astype(jnp.float32)                         # (4, H)
    w5_row = params["w5"].reshape(1, H).astype(jnp.float32)                  # (1, H)
    b5 = params["b5"].reshape(1).astype(jnp.float32)                         # (1,) scalar

    const2 = lambda i: (0, 0)
    in_specs = [
        pl.BlockSpec((tile_b, n_z), lambda i: (i, 0)),        # x streams per batch tile
        pl.BlockSpec((n_z, H), const2),                       # w1 (VMEM-resident)
        pl.BlockSpec((3, H, H), lambda i: (0, 0, 0)),         # w2..w4 stacked, resident
        pl.BlockSpec((4, H), const2),                         # b1..b4 stacked, resident
        pl.BlockSpec((1, H), const2),                         # w5 row, resident
        pl.BlockSpec(memory_space=pltpu.MemorySpace.SMEM),    # b5 scalar in SMEM
    ]

    flops = 2 * b_pad * (n_z * H + 3 * H * H + H)
    transcendentals = 2 * b_pad          # exp + divide per row
    bytes_accessed = (x.size * 4 + w1.size * 2 + wh.size * 2 + bh.size * 4
                      + w5_row.size * 4 + b5.size * 4 + b_pad * 4)

    out = pl.pallas_call(
        _discriminator_kernel,
        out_shape=jax.ShapeDtypeStruct((num_tiles, 1, tile_b), jnp.float32),
        grid=(num_tiles,),
        in_specs=in_specs,
        out_specs=pl.BlockSpec((1, 1, tile_b), lambda i: (i, 0, 0)),
        compiler_params=pltpu.CompilerParams(
            # Batch tiles are independent -> shard across TCs on v7x.
            dimension_semantics=("parallel",),
            # Plenty of headroom at tile_b<=2048 on every generation (v7x: 64 MiB phys).
            vmem_limit_bytes=32 * 1024 * 1024),
        cost_estimate=pl.CostEstimate(flops=flops,
                                      transcendentals=transcendentals,
                                      bytes_accessed=bytes_accessed),
    )(x, w1, wh, bh, w5_row, b5)

    # (num_tiles, 1, tile_b) is batch-major row order; drop pad rows, return (B, 1).
    return out.reshape(-1)[:B].reshape(B, 1)


def init_params(key, n_z, dim_h):
    """Deterministic synthetic init (PyTorch-style uniform fan-in bound)."""
    hidden = dim_h * 4
    dims = [(n_z, hidden), (hidden, hidden), (hidden, hidden),
            (hidden, hidden), (hidden, 1)]
    params = {}
    keys = jax.random.split(key, 2 * len(dims))
    for i, (fan_in, fan_out) in enumerate(dims):
        bound = 1.0 / jnp.sqrt(fan_in)
        w = jax.random.uniform(keys[2 * i], (fan_in, fan_out),
                               minval=-bound, maxval=bound, dtype=jnp.float32)
        b = jax.random.uniform(keys[2 * i + 1], (1, fan_out),
                               minval=-bound, maxval=bound, dtype=jnp.float32)
        params[f"w{i + 1}"] = w
        params[f"b{i + 1}"] = b
    return params


def reference_forward(x, params):
    """Pure-JAX f32 reference of the same math."""
    h = x
    for i in range(1, 5):
        h = jnp.maximum(h @ params[f"w{i}"] + params[f"b{i}"], 0.0)
    logits = h @ params["w5"] + params["b5"]
    return jax.nn.sigmoid(logits)


if __name__ == "__main__":
    # Shapes consistent with the module: args = {'dim_h': 32, 'n_z': 8}
    dim_h = 32
    n_z = 8

    key = jax.random.PRNGKey(0)
    k_x1, k_x2, k_x3, k_p = jax.random.split(key, 4)
    params = init_params(k_p, n_z, dim_h)

    # bf16 MXU operands => compare to the f32 reference with a loosened tolerance.
    tol = dict(atol=3e-2, rtol=3e-2)

    # 1) Small spec-sized batch: single tile sized to round_up(8, 16) = 16 rows.
    x_small = jax.random.normal(k_x1, (8, n_z), dtype=jnp.float32)
    out_small = jax.block_until_ready(discriminator_forward(x_small, params))
    ref_small = jax.block_until_ready(reference_forward(x_small, params))
    assert out_small.shape == (8, 1)
    assert jnp.allclose(out_small, ref_small, **tol), "mismatch (small batch)"

    # 2) Multi-tile batch with an explicit small tile (exercises grid pipeline,
    #    remainder padding, and output reshaping).
    x_mid = jax.random.normal(k_x2, (320, n_z), dtype=jnp.float32)
    out_mid = jax.block_until_ready(discriminator_forward(x_mid, params, tile_b=128))
    ref_mid = jax.block_until_ready(reference_forward(x_mid, params))
    assert out_mid.shape == (320, 1)
    assert jnp.allclose(out_mid, ref_mid, **tol), "mismatch (multi-tile batch)"

    # 3) Default large-tile path: 2048 rows -> 2 tiles of 1024, no padding.
    x_big = jax.random.normal(k_x3, (2048, n_z), dtype=jnp.float32)
    out_big = jax.block_until_ready(discriminator_forward(x_big, params))
    ref_big = jax.block_until_ready(reference_forward(x_big, params))
    assert out_big.shape == (2048, 1)
    assert jnp.allclose(out_big, ref_big, **tol), "mismatch (large-tile batch)"

    print("KERNEL_OK")
</pallas_src>

<mosaic_0001>
module attributes {stable_mosaic.version = 11 : i64} {
  func.func @_discriminator_kernel(%arg0: i32, %arg1: memref<16x8xf32, #tpu.memory_space<vmem>>, %arg2: memref<8x128xbf16, #tpu.memory_space<vmem>>, %arg3: memref<3x128x128xbf16, #tpu.memory_space<vmem>>, %arg4: memref<4x128xf32, #tpu.memory_space<vmem>>, %arg5: memref<1x128xf32, #tpu.memory_space<vmem>>, %arg6: memref<1xf32, #tpu.memory_space<smem>>, %arg7: memref<1x1x16xf32, #tpu.memory_space<vmem>>) attributes {dimension_semantics = [#tpu.dimension_semantics<parallel>], iteration_bounds = array<i64: 1>, scalar_prefetch = 0 : i64, scratch_operands = 0 : i64, tpu.core_type = #tpu.core_type<tc>, window_params = [{transform_indices = @transform_0, window_bounds = array<i64: 16, 8>}, {pipeline_mode = #tpu.pipeline_mode<synchronous>, transform_indices = @transform_1, window_bounds = array<i64: 8, 128>}, {pipeline_mode = #tpu.pipeline_mode<synchronous>, transform_indices = @transform_2, window_bounds = array<i64: 3, 128, 128>}, {pipeline_mode = #tpu.pipeline_mode<synchronous>, transform_indices = @transform_3, window_bounds = array<i64: 4, 128>}, {pipeline_mode = #tpu.pipeline_mode<synchronous>, transform_indices = @transform_4, window_bounds = array<i64: 1, 128>}, {transform_indices = @transform_5, window_bounds = array<i64: 1>}, {transform_indices = @transform_6, window_bounds = array<i64: 1, 1, 16>}]} {
    %c0 = arith.constant 0 : index
    %c0_0 = arith.constant 0 : index
    %0 = vector.load %arg1[%c0, %c0_0] : memref<16x8xf32, #tpu.memory_space<vmem>>, vector<16x8xf32>
    %1 = arith.truncf %0 : vector<16x8xf32> to vector<16x8xbf16>
    %c0_1 = arith.constant 0 : index
    %c0_2 = arith.constant 0 : index
    %2 = vector.load %arg4[%c0_1, %c0_2] : memref<4x128xf32, #tpu.memory_space<vmem>>, vector<4x128xf32>
    %c0_3 = arith.constant 0 : index
    %c0_4 = arith.constant 0 : index
    %3 = vector.load %arg2[%c0_3, %c0_4] : memref<8x128xbf16, #tpu.memory_space<vmem>>, vector<8x128xbf16>
    %cst = arith.constant dense<0.000000e+00> : vector<16x128xf32>
    %4 = tpu.matmul %1, %3, %cst {dimension_numbers = #tpu.dot_dimension_numbers<[1], [0], [0], [1], [0, 0, 1, 1], [], []>} : vector<16x8xbf16>, vector<8x128xbf16>, vector<16x128xf32> -> vector<16x128xf32>
    %5 = vector.extract_strided_slice %2 {offsets = [0, 0], sizes = [1, 128], strides = [1, 1]} : vector<4x128xf32> to vector<1x128xf32>
    %6 = vector.shape_cast %5 : vector<1x128xf32> to vector<128xf32>
    %7 = vector.shape_cast %6 : vector<128xf32> to vector<1x128xf32>
    %8 = vector.broadcast %7 : vector<1x128xf32> to vector<16x128xf32>
    %9 = arith.addf %4, %8 : vector<16x128xf32>
    %cst_5 = arith.constant 0.000000e+00 : f32
    %10 = vector.broadcast %cst_5 : f32 to vector<16x128xf32>
    %11 = arith.maximumf %9, %10 : vector<16x128xf32>
    %12 = arith.truncf %11 : vector<16x128xf32> to vector<16x128xbf16>
    %c0_6 = arith.constant 0 : index
    %c0_7 = arith.constant 0 : index
    %c0_8 = arith.constant 0 : index
    %13 = vector.load %arg3[%c0_6, %c0_7, %c0_8] : memref<3x128x128xbf16, #tpu.memory_space<vmem>>, vector<1x128x128xbf16>
    %14 = vector.shape_cast %13 : vector<1x128x128xbf16> to vector<128x128xbf16>
    %cst_9 = arith.constant dense<0.000000e+00> : vector<16x128xf32>
    %15 = tpu.matmul %12, %14, %cst_9 {dimension_numbers = #tpu.dot_dimension_numbers<[1], [0], [0], [1], [0, 0, 1, 1], [], []>} : vector<16x128xbf16>, vector<128x128xbf16>, vector<16x128xf32> -> vector<16x128xf32>
    %16 = vector.extract_strided_slice %2 {offsets = [1, 0], sizes = [1, 128], strides = [1, 1]} : vector<4x128xf32> to vector<1x128xf32>
    %17 = vector.shape_cast %16 : vector<1x128xf32> to vector<128xf32>
    %18 = vector.shape_cast %17 : vector<128xf32> to vector<1x128xf32>
    %19 = vector.broadcast %18 : vector<1x128xf32> to vector<16x128xf32>
    %20 = arith.addf %15, %19 : vector<16x128xf32>
    %cst_10 = arith.constant 0.000000e+00 : f32
    %21 = vector.broadcast %cst_10 : f32 to vector<16x128xf32>
    %22 = arith.maximumf %20, %21 : vector<16x128xf32>
    %23 = arith.truncf %22 : vector<16x128xf32> to vector<16x128xbf16>
    %c1 = arith.constant 1 : index
    %c0_11 = arith.constant 0 : index
    %c0_12 = arith.constant 0 : index
    %24 = vector.load %arg3[%c1, %c0_11, %c0_12] : memref<3x128x128xbf16, #tpu.memory_space<vmem>>, vector<1x128x128xbf16>
    %25 = vector.shape_cast %24 : vector<1x128x128xbf16> to vector<128x128xbf16>
    %cst_13 = arith.constant dense<0.000000e+00> : vector<16x128xf32>
    %26 = tpu.matmul %23, %25, %cst_13 {dimension_numbers = #tpu.dot_dimension_numbers<[1], [0], [0], [1], [0, 0, 1, 1], [], []>} : vector<16x128xbf16>, vector<128x128xbf16>, vector<16x128xf32> -> vector<16x128xf32>
    %27 = vector.extract_strided_slice %2 {offsets = [2, 0], sizes = [1, 128], strides = [1, 1]} : vector<4x128xf32> to vector<1x128xf32>
    %28 = vector.shape_cast %27 : vector<1x128xf32> to vector<128xf32>
    %29 = vector.shape_cast %28 : vector<128xf32> to vector<1x128xf32>
    %30 = vector.broadcast %29 : vector<1x128xf32> to vector<16x128xf32>
    %31 = arith.addf %26, %30 : vector<16x128xf32>
    %cst_14 = arith.constant 0.000000e+00 : f32
    %32 = vector.broadcast %cst_14 : f32 to vector<16x128xf32>
    %33 = arith.maximumf %31, %32 : vector<16x128xf32>
    %34 = arith.truncf %33 : vector<16x128xf32> to vector<16x128xbf16>
    %c2 = arith.constant 2 : index
    %c0_15 = arith.constant 0 : index
    %c0_16 = arith.constant 0 : index
    %35 = vector.load %arg3[%c2, %c0_15, %c0_16] : memref<3x128x128xbf16, #tpu.memory_space<vmem>>, vector<1x128x128xbf16>
    %36 = vector.shape_cast %35 : vector<1x128x128xbf16> to vector<128x128xbf16>
    %cst_17 = arith.constant dense<0.000000e+00> : vector<16x128xf32>
    %37 = tpu.matmul %34, %36, %cst_17 {dimension_numbers = #tpu.dot_dimension_numbers<[1], [0], [0], [1], [0, 0, 1, 1], [], []>} : vector<16x128xbf16>, vector<128x128xbf16>, vector<16x128xf32> -> vector<16x128xf32>
    %38 = vector.extract_strided_slice %2 {offsets = [3, 0], sizes = [1, 128], strides = [1, 1]} : vector<4x128xf32> to vector<1x128xf32>
    %39 = vector.shape_cast %38 : vector<1x128xf32> to vector<128xf32>
    %40 = vector.shape_cast %39 : vector<128xf32> to vector<1x128xf32>
    %41 = vector.broadcast %40 : vector<1x128xf32> to vector<16x128xf32>
    %42 = arith.addf %37, %41 : vector<16x128xf32>
    %cst_18 = arith.constant 0.000000e+00 : f32
    %43 = vector.broadcast %cst_18 : f32 to vector<16x128xf32>
    %44 = arith.maximumf %42, %43 : vector<16x128xf32>
    %c0_19 = arith.constant 0 : index
    %c0_20 = arith.constant 0 : index
    %45 = vector.load %arg5[%c0_19, %c0_20] : memref<1x128xf32, #tpu.memory_space<vmem>>, vector<1x128xf32>
    %46 = tpu.transpose %44, [1, 0] : vector<16x128xf32> -> vector<128x16xf32>
    %cst_21 = arith.constant dense<0.000000e+00> : vector<1x16xf32>
    %47 = tpu.matmul %45, %46, %cst_21 {dimension_numbers = #tpu.dot_dimension_numbers<[1], [0], [0], [1], [0, 0, 1, 1], [], []>} : vector<1x128xf32>, vector<128x16xf32>, vector<1x16xf32> -> vector<1x16xf32>
    %c0_22 = arith.constant 0 : index
    %48 = memref.load %arg6[%c0_22] : memref<1xf32, #tpu.memory_space<smem>>
    %49 = vector.broadcast %48 : f32 to vector<1x16xf32>
    %50 = arith.addf %47, %49 : vector<1x16xf32>
    %cst_23 = arith.constant 0.000000e+00 : f32
    %51 = vector.broadcast %cst_23 : f32 to vector<1x16xf32>
    %52 = arith.subf %51, %50 : vector<1x16xf32>
    %53 = math.exp %52 : vector<1x16xf32>
    %cst_24 = arith.constant 1.000000e+00 : f32
    %54 = vector.broadcast %cst_24 : f32 to vector<1x16xf32>
    %55 = arith.addf %54, %53 : vector<1x16xf32>
    %cst_25 = arith.constant 1.000000e+00 : f32
    %56 = vector.broadcast %cst_25 : f32 to vector<1x16xf32>
    %57 = arith.divf %56, %55 : vector<1x16xf32>
    %c0_26 = arith.constant 0 : index
    %c0_27 = arith.constant 0 : index
    %c0_28 = arith.constant 0 : index
    %58 = vector.load %arg7[%c0_26, %c0_27, %c0_28] : memref<1x1x16xf32, #tpu.memory_space<vmem>>, vector<1x1x16xf32>
    %59 = vector.shape_cast %58 : vector<1x1x16xf32> to vector<1x16xf32>
    %60 = vector.shape_cast %57 : vector<1x16xf32> to vector<1x1x16xf32>
    tpu.vector_store %arg7[%c0_26, %c0_27, %c0_28], %60 {strides = array<i32>} : memref<1x1x16xf32, #tpu.memory_space<vmem>>, vector<1x1x16xf32>,
    return
  }
  func.func @transform_0(%arg0: i32) -> (i32, i32) {
    %c0_i32 = arith.constant 0 : i32
    %c0_i32_0 = arith.constant 0 : i32
    return %arg0, %c0_i32 : i32, i32
  }
  func.func @transform_1(%arg0: i32) -> (i32, i32) {
    %c0_i32 = arith.constant 0 : i32
    %c0_i32_0 = arith.constant 0 : i32
    %c0_i32_1 = arith.constant 0 : i32
    return %c0_i32, %c0_i32_0 : i32, i32
  }
  func.func @transform_2(%arg0: i32) -> (i32, i32, i32) {
    %c0_i32 = arith.constant 0 : i32
    %c0_i32_0 = arith.constant 0 : i32
    %c0_i32_1 = arith.constant 0 : i32
    %c0_i32_2 = arith.constant 0 : i32
    return %c0_i32, %c0_i32_0, %c0_i32_1 : i32, i32, i32
  }
  func.func @transform_3(%arg0: i32) -> (i32, i32) {
    %c0_i32 = arith.constant 0 : i32
    %c0_i32_0 = arith.constant 0 : i32
    %c0_i32_1 = arith.constant 0 : i32
    return %c0_i32, %c0_i32_0 : i32, i32
  }
  func.func @transform_4(%arg0: i32) -> (i32, i32) {
    %c0_i32 = arith.constant 0 : i32
    %c0_i32_0 = arith.constant 0 : i32
    %c0_i32_1 = arith.constant 0 : i32
    return %c0_i32, %c0_i32_0 : i32, i32
  }
  func.func @transform_5(%arg0: i32) -> i32 {
    %c0_i32 = arith.constant 0 : i32
    %c0_i32_0 = arith.constant 0 : i32
    return %c0_i32 : i32
  }
  func.func @transform_6(%arg0: i32) -> (i32, i32, i32) {
    %c0_i32 = arith.constant 0 : i32
    %c0_i32_0 = arith.constant 0 : i32
    %c0_i32_1 = arith.constant 0 : i32
    return %arg0, %c0_i32, %c0_i32_0 : i32, i32, i32
  }
}

</mosaic_0001>

<bundles_post_ra>
// kernel: tpu_custom_call.1
= control target key start
LH: loop header
LB: loop body
LE: loop exit
PB: predicated region body
PF: predicated region fallthrough
CT: control target
= control target key end

     0   :  { %12 = vsyncpa [#allocation4], 0  ;;  %s881_s0 = inlined_call_operand.vmem [shape: f32[16,8], index: 0, kind: input, shape index: {}]   ;;  %s882_s1 = inlined_call_operand.vmem [shape: bf16[8,128], index: 1, kind: input, shape index: {}]   ;;  %s883_s2 = inlined_call_operand.hbm [shape: bf16[3,128,128], index: 2, kind: input, shape index: {}]   ;;  %s884_s3 = inlined_call_operand.vmem [shape: f32[4,128], index: 3, kind: input, shape index: {}]   ;;  %s885_s4 = inlined_call_operand.vmem [shape: f32[1,128], index: 4, kind: input, shape index: {}]   ;;  %s886_s5 = inlined_call_operand.<no memory space> [shape: f32[1], index: 5, kind: input, shape index: {}]   ;;  %s887_s6 = inlined_call_operand.hbm [shape: f32[1,1,16], index: 6, kind: output, shape index: {}]  }
   0x1   :  { %13 = vsyncpa [#allocation5], 0  ;;  %s750_s21 = smov [#allocation3]   ;;  %s702_s25 = scalar_lea.hbm %s883_s2, 3072 }
   0x2   :  { %s23_s22 = sshll.u32 %s750_s21, 4  ;;  %p703_p0 = scmp.ne.s32.totalorder %s883_s2, %s702_s25  ;;  %s24_s22 = int_to_ptr.vmem [resolvable:$true] %s23_s22 }
   0x3   :  { %p706_p1 = scmp.lt.u32.totalorder %s702_s25, %s883_s2 }
   0x5   :  { %p708_p2 = pnand %p706_p1, %p703_p0 }
   0x7   :  { %711 = shalt.err (!%p708_p2)
}
   0x8   :  { %s712_s30 = scalar_lea.vmem %s24_s22, 3072  ;;  %p717_p4 = scmp.lt.s32.totalorder %s24_s22, %s24_s22 }
   0x9   :  { %p713_p3 = scmp.ne.s32.totalorder %s24_s22, %s712_s30  ;;  %p718_p5 = scmp.lt.s32.totalorder %s712_s30, %s712_s30 }
   0xb   :  { %p719_p6 = por %p718_p5, %p717_p4 }
   0xd   :  { %p720_p7 = pnand %p719_p6, %p713_p3 }
   0xf   :  { %723 = shalt.err (!%p720_p7)
}
  0x10   :  { %s751_s7 = smov 64   ;;  %s752_s8 = smov 4  }
  0x11   :  { %29 = dma.hbm_to_vmem [thread:$0]  %s883_s2, 3072, %s24_s22, [#allocation4], %s751_s7, %s751_s7, %s752_s8  }
  0x12   :  { %746 = dma.done.wait [#allocation4], 3072  }
  0x13   :  { %747 = vsyncadd [#allocation4], 4294964224  ;;  %v753_v0 = vmov 0.0   ;;  %vm754_vm0 = vmmov 0   ;;  %vm53_vm1 = vcmask 1043456   ;;  %v40_v2 = vld [vmem:[%s881_s0] sm:$0xff]  ;;  %v45_v20 = vlaneseq }
  0x14   :  { %591 = vmatprep.subr.bf16.mxu0 %v753_v0  ;;  %593 = vmatprep.mubr.msk.bf16.mxu0 %vm754_vm0, %v753_v0  ;;  %v44_v1 = vld [vmem:[%s882_s1] sm:$0xf]  ;;  %v41_v3 = vld [vmem:[%s881_s0 + $0x8] sm:$0xff]  ;;  %vm49_vm2 = vcmask 64512   ;;  %v676_v8 = vld [vmem:[#allocation3 + $0x10] sm:$0xff]   ;;  %s756_s19 = smov [#allocation6]  }
  0x15   :  { %597 = vmatprep.subr.bf16.mxu1 %v753_v0  ;;  %613 = vmatprep.mubr.msk.bf16.mxu1 %vm754_vm0, %v753_v0  ;;  %v55_v4 = vsel %vm53_vm1, %v44_v1, 0  ;;  %v42_v5 = vpack.c.bf16 %v41_v3, %v40_v2  ;;  %v674_v6 = vld [vmem:[#allocation3] sm:$0xff]   ;;  %v675_v7 = vld [vmem:[#allocation3 + $0x8] sm:$0xff]   ;;  %v677_v9 = vld [vmem:[#allocation3 + $0x18] sm:$0xff]   ;;  %v836_v21 = vshrl.u32 %v45_v20, 7  ;;  %v755_v3 = vmov 0.0|0.0  }
  0x16   :  { %592 = vmatpush3.bf16.msra.mxu0 %v55_v4  ;;  %598 = vmatpush3.bf16.msra.mxu1 %v674_v6  ;;  %v678_v10 = vld [vmem:[#allocation3 + $0x20] sm:$0xff]   ;;  %v679_v11 = vld [vmem:[#allocation3 + $0x28] sm:$0xff]   ;;  %v680_v12 = vld [vmem:[#allocation3 + $0x30] sm:$0xff]   ;;  %s525_s20 = sshll.u32 %s756_s19, 4  ;;  %vm517_vm3 = vcmask 122880   ;;  %s526_s20 = int_to_ptr.vmem [resolvable:$true] %s525_s20 }
  0x17   :  { %617 = vmatprep.subr.bf16.mxu0 %v753_v0  ;;  %599 = vmatprep.subr.bf16.mxu1 %v753_v0  ;;  %v681_v13 = vld [vmem:[#allocation3 + $0x38] sm:$0xff]   ;;  %v682_v14 = vld [vmem:[#allocation3 + $0x40] sm:$0xff]   ;;  %v683_v15 = vld [vmem:[#allocation3 + $0x48] sm:$0xff]   ;;  %v47_v22 = vsub.s32 0, %v836_v21  ;;  %v119_v42 = vsub.s32 1, %v836_v21  ;;  %v232_v55 = vsub.s32 2, %v836_v21  ;;  %p729_p9 = scmp.lt.s32.totalorder %s526_s20, %s526_s20 }
  0x18   :  { %v684_v16 = vld [vmem:[#allocation3 + $0x50] sm:$0xff]   ;;  %v685_v17 = vld [vmem:[#allocation3 + $0x58] sm:$0xff]   ;;  %v686_v18 = vld [vmem:[#allocation3 + $0x60] sm:$0xff]   ;;  %s728_s21 = scalar_lea.vmem %s526_s20, 32 }
  0x19   :  { %594 = vmatmul.mubr.msk.bf16.vlgmr.msra.gmra.mrb[0].mxu0 %vm49_vm2, %v42_v5  ;;  %v687_v19 = vld [vmem:[#allocation3 + $0x68] sm:$0xff]   ;;  %v842_v23 = vld [vmem:[%s884_s3] sm:$0xf]  ;;  %v688_v34 = vld [vmem:[#allocation3 + $0x70] sm:$0xff]  }
  0x1a   :  { %633 = vmatprep.mubr.msk.bf16.mxu0 %vm754_vm0, %v753_v0  ;;  %600 = vmatpush3.bf16.msra.mxu1 %v675_v7  ;;  %v48_v24 = vrot.slane %v842_v23, %v47_v22  ;;  %v689_v35 = vld [vmem:[#allocation3 + $0x78] sm:$0xff]   ;;  %v690_v36 = vld [vmem:[#allocation3 + $0x80] sm:$0xff]   ;;  %v691_v37 = vld [vmem:[#allocation3 + $0x88] sm:$0xff]   ;;  %v120_v43 = vrot.slane %v842_v23, %v119_v42  ;;  %v233_v56 = vrot.slane %v842_v23, %v232_v55 }
  0x1b   :  { %601 = vmatprep.subr.bf16.mxu1 %v753_v0  ;;  %618 = vmatpush3.bf16.msra.mxu0 %v682_v14  ;;  %v692_v38 = vld [vmem:[#allocation3 + $0x90] sm:$0xff]   ;;  %v693_v39 = vld [vmem:[#allocation3 + $0x98] sm:$0xff]   ;;  %v694_v40 = vld [vmem:[#allocation3 + $0xa0] sm:$0xff]  }
  0x1c   :  { %619 = vmatprep.subr.bf16.mxu0 %v753_v0  ;;  %v695_v41 = vld [vmem:[#allocation3 + $0xa8] sm:$0xff]   ;;  %v696_v53 = vld [vmem:[#allocation3 + $0xb0] sm:$0xff]   ;;  %v697_v54 = vld [vmem:[#allocation3 + $0xb8] sm:$0xff]  }
  0x1d   :  { %v438_v14 = vld [vmem:[%s885_s4] sm:$0x1]  ;;  %s724_s4 = scalar_lea.vmem %s526_s20, 16 }
  0x1e   :  { %602 = vmatpush3.bf16.msra.mxu1 %v676_v8  ;;  %p725_p8 = scmp.ne.s32.totalorder %s526_s20, %s724_s4  ;;  %p730_p10 = scmp.lt.s32.totalorder %s728_s21, %s724_s4 }
  0x1f   :  { %603 = vmatprep.subr.bf16.mxu1 %v753_v0  ;;  %620 = vmatpush3.bf16.msra.mxu0 %v683_v15  ;;  %v440_v15 = vstv %s886_s5 }
  0x20   :  { %621 = vmatprep.subr.bf16.mxu0 %v753_v0  ;;  %p731_p11 = por %p730_p10, %p729_p9 }
  0x22   :  { %604 = vmatpush3.bf16.msra.mxu1 %v677_v9  ;;  %p732_p12 = pnand %p731_p11, %p725_p8 }
  0x23   :  { %605 = vmatprep.subr.bf16.mxu1 %v753_v0  ;;  %622 = vmatpush3.bf16.msra.mxu0 %v684_v16 }
  0x24   :  { %623 = vmatprep.subr.bf16.mxu0 %v753_v0 }
  0x26   :  { %606 = vmatpush3.bf16.msra.mxu1 %v678_v10 }
  0x27   :  { %607 = vmatprep.subr.bf16.mxu1 %v753_v0  ;;  %624 = vmatpush3.bf16.msra.mxu0 %v685_v17 }
  0x28   :  { %625 = vmatprep.subr.bf16.mxu0 %v753_v0 }
  0x2a   :  { %608 = vmatpush3.bf16.msra.mxu1 %v679_v11 }
  0x2b   :  { %609 = vmatprep.subr.bf16.mxu1 %v753_v0  ;;  %626 = vmatpush3.bf16.msra.mxu0 %v686_v18 }
  0x2c   :  { %627 = vmatprep.subr.bf16.mxu0 %v753_v0 }
  0x2e   :  { %610 = vmatpush3.bf16.msra.mxu1 %v680_v12 }
  0x2f   :  { %611 = vmatprep.subr.bf16.mxu1 %v753_v0  ;;  %628 = vmatpush3.bf16.msra.mxu0 %v687_v19 }
  0x30   :  { %629 = vmatprep.subr.bf16.mxu0 %v753_v0 }
  0x32   :  { %612 = vmatpush3.bf16.msra.mxu1 %v681_v13 }
  0x33   :  { %637 = vmatprep.subr.bf16.mxu1 %v753_v0  ;;  %630 = vmatpush3.bf16.msra.mxu0 %v688_v34 }
  0x34   :  { %631 = vmatprep.subr.bf16.mxu0 %v753_v0 }
  0x37   :  { %632 = vmatpush3.bf16.msra.mxu0 %v689_v35 }
  0x38   :  { %664 = vmatprep.subr.bf16.mxu0 %v755_v3 }
  0xec   :  { %v91_v25 = vpop.f32.mrb[0].mxu0 }
  0xed   :  { %v92_v26 = vadd.f32 %v91_v25, %v48_v24  ;;  %v595_v27 = vpop.f32.mrb[1].mxu0 }
  0xee   :  { %v94_v28 = vpop.f32.mrb[2].mxu0 }
  0xef   :  { %v95_v29 = vadd.f32 %v94_v28, %v48_v24  ;;  %v596_v30 = vpop.f32.mrb[3].mxu0  ;;  %v98_v31 = vmax.f32 %v92_v26, 0.0 }
  0xf1   :  { %v99_v32 = vmax.f32 %v95_v29, 0.0 }
  0xf3   :  { %v100_v33 = vpack.c.bf16 %v99_v32, %v98_v31 }
  0xf5   :  { %614 = vmatmul.mubr.bf16.vlgmr.msra.gmra.mrb[0].mxu1 %v100_v33 }
  0xf6   :  { %653 = vmatprep.mubr.msk.bf16.mxu1 %vm754_vm0, %v753_v0  ;;  %638 = vmatpush3.bf16.msra.mxu1 %v690_v36 }
  0xf7   :  { %639 = vmatprep.subr.bf16.mxu1 %v753_v0 }
  0xfa   :  { %640 = vmatpush3.bf16.msra.mxu1 %v691_v37 }
  0xfb   :  { %641 = vmatprep.subr.bf16.mxu1 %v753_v0 }
  0xfe   :  { %642 = vmatpush3.bf16.msra.mxu1 %v692_v38 }
  0xff   :  { %643 = vmatprep.subr.bf16.mxu1 %v753_v0 }
 0x102   :  { %644 = vmatpush3.bf16.msra.mxu1 %v693_v39 }
 0x103   :  { %645 = vmatprep.subr.bf16.mxu1 %v753_v0 }
 0x106   :  { %646 = vmatpush3.bf16.msra.mxu1 %v694_v40 }
 0x107   :  { %647 = vmatprep.subr.bf16.mxu1 %v753_v0 }
 0x10a   :  { %648 = vmatpush3.bf16.msra.mxu1 %v695_v41 }
 0x10b   :  { %649 = vmatprep.subr.bf16.mxu1 %v753_v0 }
 0x10e   :  { %650 = vmatpush3.bf16.msra.mxu1 %v696_v53 }
 0x10f   :  { %651 = vmatprep.subr.bf16.mxu1 %v753_v0 }
 0x112   :  { %652 = vmatpush3.bf16.msra.mxu1 %v697_v54 }
 0x1c8   :  { %v203_v44 = vpop.f32.mrb[0].mxu1 }
 0x1c9   :  { %v204_v45 = vadd.f32 %v203_v44, %v120_v43  ;;  %v615_v46 = vpop.f32.mrb[1].mxu1 }
 0x1ca   :  { %v206_v47 = vpop.f32.mrb[2].mxu1 }
 0x1cb   :  { %v207_v48 = vadd.f32 %v206_v47, %v120_v43  ;;  %v616_v49 = vpop.f32.mrb[3].mxu1  ;;  %v210_v50 = vmax.f32 %v204_v45, 0.0 }
 0x1cd   :  { %v211_v51 = vmax.f32 %v207_v48, 0.0 }
 0x1cf   :  { %v212_v52 = vpack.c.bf16 %v211_v51, %v210_v50 }
 0x1d1   :  { %634 = vmatmul.mubr.bf16.vlgmr.msra.gmra.mrb[4].mxu0 %v212_v52 }
 0x1d2   :  { %661 = vmatprep.mubr.msk.f32.mxu0 %vm754_vm0, %v753_v0  ;;  %v345_v0 = vsub.s32 3, %v836_v21 }
 0x1d4   :  { %v346_v4 = vrot.slane %v842_v23, %v345_v0 }
 0x2a4   :  { %v316_v57 = vpop.f32.mrb[4].mxu0 }
 0x2a5   :  { %v317_v58 = vadd.f32 %v316_v57, %v233_v56  ;;  %v635_v59 = vpop.f32.mrb[5].mxu0 }
 0x2a6   :  { %v319_v60 = vpop.f32.mrb[6].mxu0 }
 0x2a7   :  { %v320_v61 = vadd.f32 %v319_v60, %v233_v56  ;;  %v636_v62 = vpop.f32.mrb[7].mxu0  ;;  %v323_v63 = vmax.f32 %v317_v58, 0.0 }
 0x2a9   :  { %v324_v1 = vmax.f32 %v320_v61, 0.0 }
 0x2ab   :  { %v325_v2 = vpack.c.bf16 %v324_v1, %v323_v63 }
 0x2ad   :  { %654 = vmatmul.mubr.bf16.vlgmr.msra.gmra.mrb[4].mxu1 %v325_v2 }
 0x380   :  { %v429_v5 = vpop.f32.mrb[4].mxu1 }
 0x381   :  { %v430_v6 = vadd.f32 %v429_v5, %v346_v4  ;;  %v655_v7 = vpop.f32.mrb[5].mxu1 }
 0x382   :  { %v432_v8 = vpop.f32.mrb[6].mxu1 }
 0x383   :  { %v433_v9 = vadd.f32 %v432_v8, %v346_v4  ;;  %v656_v10 = vpop.f32.mrb[7].mxu1  ;;  %v436_v11 = vmax.f32 %v430_v6, 0.0 }
 0x385   :  { %v437_v12 = vmax.f32 %v433_v9, 0.0 }
 0x387   :  { %v665_v13 = vpack.c.bf16 %v437_v12, %v436_v11 }
 0x389   :  { %666 = vmatpush3.bf16.xpose.msra.mxu0 %v665_v13 }
 0x390   :  { %662 = vmatmul.mubr.f32.vlgmr.msra.gmra.mrb[8].mxu0 %v438_v14 }
 0x463   :  { %v507_v16 = vpop.f32.mrb[8].mxu0 }
 0x464   :  { %v508_v17 = vadd.f32 %v507_v16, %v440_v15  ;;  %v663_v18 = vpop.f32.mrb[9].mxu0 }
 0x466   :  { %v511_v19 = vsub.f32 0.0, %v508_v17 }
 0x468   :  { %v512_v20 = vmul.f32 1.442695, %v511_v19 }
 0x46a   :  { %698 = vpow2.f32 %v512_v20 }
 0x474   :  { %v699_v21 = vpop.eup %698 }
 0x475   :  { %v514_v22 = vadd.f32 1.0, %v699_v21 }
 0x477   :  { %700 = vrcp.f32 %v514_v22 }
 0x481   :  { %v701_v23 = vpop.eup %700 }
 0x482   :  { %518 = vst.msk [vmem:[#allocation6] sm:$0x1] %vm517_vm3, %v701_v23 }
 0x483   :  { %735 = shalt.err (!%p732_p12)
}
 0x484   :  { %s736_s23 = scalar_lea.hbm %s887_s6, 16 }
 0x485   :  { %p737_p13 = scmp.ne.s32.totalorder %s887_s6, %s736_s23  ;;  %p740_p0 = scmp.lt.u32.totalorder %s736_s23, %s887_s6 }
 0x487   :  { %p742_p1 = pnand %p740_p0, %p737_p13 }
 0x489   :  { %745 = shalt.err (!%p742_p1)
}
 0x48a   :  { %528 = dma.vmem_to_hbm [thread:$0]  %s526_s20, 16, %s887_s6, [#allocation5]  }
 0x48b   :  { %748 = dma.done.wait [#allocation5], 16  }
 0x48c   :  { %749 = vsyncadd [#allocation5], 4294967280 }
 0x48d   :  { %532 = vsyncpa [#allocation4], 1 }
 0x48e   :  { %533 = vsyncpa [#allocation5], 1 }

</bundles_post_ra>
